<compile_context>
chip_gen: v7x
topology: tpu7x:2x2x1
jax: 0.10.0
libtpu: 0.0.40
codegen_flags: <defaults>
</compile_context>

<pallas_src>
import jax
import jax.numpy as jnp
import numpy as np
from jax.experimental import pallas as pl
from jax.experimental.pallas import tpu as pltpu

KP = 32        # im2col contraction dim, 9*CIN=27 zero-padded to 32
CP = 128       # backbone feature dim, C=32 zero-padded to a full lane width
HEADS_P = 128  # head output dim, 2 real columns zero-padded to a lane width


def separate_model_snr_kernel(patches_ref, wconv_ref, bconv_ref, pool_ref,
                              snr_ref, hwf_ref, hws_ref, hb_ref,
                              cls_out_ref, reg_out_ref):
    """Single-invocation forward pass (shapes are tiny; everything fits VMEM).

    patches_ref : (B*HW, KP)  bf16  im2col image patches (zero-padded K)
    wconv_ref   : (KP, CP)    bf16  conv taps as a GEMM weight (zero-padded)
    bconv_ref   : (1, CP)     f32   conv bias (zero-padded)
    pool_ref    : (B, B*HW)   f32   block-diagonal 1/HW average-pool matrix
    snr_ref     : (B, 128)    f32
    hwf_ref     : (CP, 128)   f32   head weights for backbone feats
                                    (col 0 = cls_pred, col 1 = reg_pred)
    hws_ref     : (128, 128)  f32   head weights for snr (col 1 = reg_pred)
    hb_ref      : (1, 128)    f32   head biases (col 0 = bcls, col 1 = breg)
    cls_out_ref : (B, 1)
    reg_out_ref : (B, 1)
    """
    # Shared backbone: im2col conv as one MXU GEMM (bf16 in, f32 accumulate).
    conv = jnp.dot(patches_ref[...], wconv_ref[...],
                   preferred_element_type=jnp.float32)        # (B*HW, CP)
    h = jnp.maximum(conv + bconv_ref[...], 0.0)               # ReLU

    # Global average pool as a second MXU GEMM (one pass, no concat/copies).
    feats = jnp.dot(pool_ref[...], h,
                    preferred_element_type=jnp.float32)       # (B, CP)

    # Fused heads: lane-dense GEMMs; column 0 -> cls logit, column 1 -> reg.
    snr = snr_ref[...].astype(jnp.float32)
    logits = (jnp.dot(feats, hwf_ref[...], preferred_element_type=jnp.float32)
              + jnp.dot(snr, hws_ref[...], preferred_element_type=jnp.float32)
              + hb_ref[...])                                  # (B, 128)

    cls_out_ref[...] = jax.nn.sigmoid(logits[:, 0:1])
    reg_out_ref[...] = jnp.maximum(logits[:, 1:2], 0.0)


@jax.jit
def separate_model_snr(image_nchw, snr, params):
    """NCHW image + (B,128) snr -> (cls, reg), one fused dispatch."""
    B, CIN, H, W = image_nchw.shape
    HW = H * W
    C = params["wconv"].shape[-1]
    K = 9 * CIN

    # NCHW -> NHWC, 'same' zero padding, im2col to (B*HW, K), lane-pad K.
    x = jnp.transpose(image_nchw, (0, 2, 3, 1))
    xp = jnp.pad(x, ((0, 0), (1, 1), (1, 1), (0, 0)))
    taps = [xp[:, dy:dy + H, dx:dx + W, :]
            for dy in range(3) for dx in range(3)]
    patches = jnp.stack(taps, axis=3).reshape(B * HW, K)       # (B*HW, 27)
    patches = jnp.pad(patches, ((0, 0), (0, KP - K))).astype(jnp.bfloat16)

    # Conv taps (9, CIN, C) -> GEMM weight (KP, CP), zero-padded, bf16.
    w_conv = params["wconv"].reshape(K, C)
    w_conv = jnp.pad(w_conv, ((0, KP - K), (0, CP - C))).astype(jnp.bfloat16)
    b_conv = jnp.pad(params["bconv"], ((0, 0), (0, CP - C))).astype(jnp.float32)

    # Average pooling as a (B, B*HW) block-diagonal 1/HW matrix (MXU GEMM).
    pool = ((jnp.arange(B)[:, None] == (jnp.arange(B * HW)[None, :] // HW))
            .astype(jnp.float32) / HW)

    # Fused head weights: col 0 = cls_pred, col 1 = reg_pred, rest zero-pad.
    hw_feat = jnp.zeros((CP, HEADS_P), jnp.float32)
    hw_feat = hw_feat.at[:C, 0].set(params["wcls"][0])
    hw_feat = hw_feat.at[:C, 1].set(params["wregf"][0])
    hw_snr = jnp.zeros((128, HEADS_P), jnp.float32)
    hw_snr = hw_snr.at[:, 1].set(params["wregs"][0])
    head_b = jnp.zeros((1, HEADS_P), jnp.float32)
    head_b = head_b.at[0, 0].set(params["bcls"][0, 0])
    head_b = head_b.at[0, 1].set(params["breg"][0, 0])

    inputs = (patches, w_conv, b_conv, pool, snr.astype(jnp.float32),
              hw_feat, hw_snr, head_b)
    vmem = pl.BlockSpec(memory_space=pltpu.MemorySpace.VMEM)
    cls, reg = pl.pallas_call(
        separate_model_snr_kernel,
        out_shape=(jax.ShapeDtypeStruct((B, 1), jnp.float32),
                   jax.ShapeDtypeStruct((B, 1), jnp.float32)),
        in_specs=[vmem] * len(inputs),
        out_specs=(vmem, vmem),
    )(*inputs)
    return cls, reg


def _reference(image_nchw, snr, params):
    """Pure-JAX f32 reference implementing the same forward math."""
    x = jnp.transpose(image_nchw, (0, 2, 3, 1))
    xp = jnp.pad(x, ((0, 0), (1, 1), (1, 1), (0, 0)))
    B, H, W, CIN = x.shape
    w = params["wconv"]                                        # (9, CIN, C)
    C = w.shape[-1]

    acc = jnp.zeros((B, H, W, C), jnp.float32)
    for k in range(9):
        dy, dx = k // 3, k % 3
        acc = acc + jnp.einsum("bhwc,cf->bhwf",
                               xp[:, dy:dy + H, dx:dx + W, :], w[k])
    acc = jnp.maximum(acc + params["bconv"][0], 0.0)
    feats = jnp.mean(acc, axis=(1, 2))                         # (B, C)

    cls = jax.nn.sigmoid(jnp.sum(feats * params["wcls"], -1, keepdims=True)
                         + params["bcls"])
    reg = jnp.maximum(jnp.sum(feats * params["wregf"], -1, keepdims=True)
                      + jnp.sum(snr * params["wregs"], -1, keepdims=True)
                      + params["breg"], 0.0)
    return cls, reg


if __name__ == "__main__":
    B, CIN, S, C = 2, 3, 16, 32        # batch, in-channels, spatial, n_feats
    key = jax.random.PRNGKey(0)
    k_img, k_snr, k_wc, k_bc, k_cls, k_reg = jax.random.split(key, 6)

    image = jax.random.normal(k_img, (B, CIN, S, S), jnp.float32)   # NCHW
    snr = jax.random.normal(k_snr, (B, 128), jnp.float32)

    # One shared backbone weight set: in the PyTorch module both BackBones
    # wrap the SAME base_model object, so cls_fe and reg_fe share weights.
    wconv = (0.1 * jax.random.normal(k_wc, (3, 3, CIN, C), jnp.float32)
             ).reshape(9, CIN, C)
    bconv = 0.01 * jax.random.normal(k_bc, (1, C), jnp.float32)
    wcls_full = 0.1 * jax.random.normal(k_cls, (1, C), jnp.float32)
    wreg_full = 0.1 * jax.random.normal(k_reg, (1, C + 128), jnp.float32)

    params = dict(
        wconv=wconv, bconv=bconv,
        wcls=wcls_full, bcls=jnp.full((1, 1), 0.05, jnp.float32),
        wregf=wreg_full[:, :C], wregs=wreg_full[:, C:],
        breg=jnp.full((1, 1), -0.05, jnp.float32),
    )

    cls_out, reg_out = separate_model_snr(image, snr, params)
    jax.block_until_ready((cls_out, reg_out))

    cls_ref, reg_ref = _reference(image, snr, params)
    # Tolerance reflects the bf16 conv GEMM inputs (f32 accumulation).
    np.testing.assert_allclose(np.asarray(cls_out), np.asarray(cls_ref),
                               rtol=1e-2, atol=1e-2)
    np.testing.assert_allclose(np.asarray(reg_out), np.asarray(reg_ref),
                               rtol=1e-2, atol=1e-2)

    print("KERNEL_OK")
</pallas_src>

<mosaic_0001>
module attributes {stable_mosaic.version = 11 : i64} {
  func.func @separate_model_snr_kernel(%arg0: memref<512x32xbf16, #tpu.memory_space<vmem>>, %arg1: memref<32x128xbf16, #tpu.memory_space<vmem>>, %arg2: memref<1x128xf32, #tpu.memory_space<vmem>>, %arg3: memref<2x512xf32, #tpu.memory_space<vmem>>, %arg4: memref<2x128xf32, #tpu.memory_space<vmem>>, %arg5: memref<128x128xf32, #tpu.memory_space<vmem>>, %arg6: memref<128x128xf32, #tpu.memory_space<vmem>>, %arg7: memref<1x128xf32, #tpu.memory_space<vmem>>, %arg8: memref<2x1xf32, #tpu.memory_space<vmem>>, %arg9: memref<2x1xf32, #tpu.memory_space<vmem>>) attributes {dimension_semantics = [], scalar_prefetch = 0 : i64, scratch_operands = 0 : i64, tpu.core_type = #tpu.core_type<tc>} {
    %c0 = arith.constant 0 : index
    %c0_0 = arith.constant 0 : index
    %0 = vector.load %arg0[%c0, %c0_0] : memref<512x32xbf16, #tpu.memory_space<vmem>>, vector<512x32xbf16>
    %c0_1 = arith.constant 0 : index
    %c0_2 = arith.constant 0 : index
    %1 = vector.load %arg1[%c0_1, %c0_2] : memref<32x128xbf16, #tpu.memory_space<vmem>>, vector<32x128xbf16>
    %cst = arith.constant dense<0.000000e+00> : vector<512x128xf32>
    %2 = tpu.matmul %0, %1, %cst {dimension_numbers = #tpu.dot_dimension_numbers<[1], [0], [0], [1], [0, 0, 1, 1], [], []>} : vector<512x32xbf16>, vector<32x128xbf16>, vector<512x128xf32> -> vector<512x128xf32>
    %c0_3 = arith.constant 0 : index
    %c0_4 = arith.constant 0 : index
    %3 = vector.load %arg2[%c0_3, %c0_4] : memref<1x128xf32, #tpu.memory_space<vmem>>, vector<1x128xf32>
    %4 = vector.broadcast %3 : vector<1x128xf32> to vector<512x128xf32>
    %5 = arith.addf %2, %4 : vector<512x128xf32>
    %cst_5 = arith.constant 0.000000e+00 : f32
    %6 = vector.broadcast %cst_5 : f32 to vector<512x128xf32>
    %7 = arith.maximumf %5, %6 : vector<512x128xf32>
    %c0_6 = arith.constant 0 : index
    %c0_7 = arith.constant 0 : index
    %8 = vector.load %arg3[%c0_6, %c0_7] : memref<2x512xf32, #tpu.memory_space<vmem>>, vector<2x512xf32>
    %cst_8 = arith.constant dense<0.000000e+00> : vector<2x128xf32>
    %9 = tpu.matmul %8, %7, %cst_8 {dimension_numbers = #tpu.dot_dimension_numbers<[1], [0], [0], [1], [0, 0, 1, 1], [], []>} : vector<2x512xf32>, vector<512x128xf32>, vector<2x128xf32> -> vector<2x128xf32>
    %c0_9 = arith.constant 0 : index
    %c0_10 = arith.constant 0 : index
    %10 = vector.load %arg4[%c0_9, %c0_10] : memref<2x128xf32, #tpu.memory_space<vmem>>, vector<2x128xf32>
    %c0_11 = arith.constant 0 : index
    %c0_12 = arith.constant 0 : index
    %11 = vector.load %arg5[%c0_11, %c0_12] : memref<128x128xf32, #tpu.memory_space<vmem>>, vector<128x128xf32>
    %cst_13 = arith.constant dense<0.000000e+00> : vector<2x128xf32>
    %12 = tpu.matmul %9, %11, %cst_13 {dimension_numbers = #tpu.dot_dimension_numbers<[1], [0], [0], [1], [0, 0, 1, 1], [], []>} : vector<2x128xf32>, vector<128x128xf32>, vector<2x128xf32> -> vector<2x128xf32>
    %c0_14 = arith.constant 0 : index
    %c0_15 = arith.constant 0 : index
    %13 = vector.load %arg6[%c0_14, %c0_15] : memref<128x128xf32, #tpu.memory_space<vmem>>, vector<128x128xf32>
    %cst_16 = arith.constant dense<0.000000e+00> : vector<2x128xf32>
    %14 = tpu.matmul %10, %13, %cst_16 {dimension_numbers = #tpu.dot_dimension_numbers<[1], [0], [0], [1], [0, 0, 1, 1], [], []>} : vector<2x128xf32>, vector<128x128xf32>, vector<2x128xf32> -> vector<2x128xf32>
    %15 = arith.addf %12, %14 : vector<2x128xf32>
    %c0_17 = arith.constant 0 : index
    %c0_18 = arith.constant 0 : index
    %16 = vector.load %arg7[%c0_17, %c0_18] : memref<1x128xf32, #tpu.memory_space<vmem>>, vector<1x128xf32>
    %17 = vector.broadcast %16 : vector<1x128xf32> to vector<2x128xf32>
    %18 = arith.addf %15, %17 : vector<2x128xf32>
    %19 = vector.extract_strided_slice %18 {offsets = [0, 0], sizes = [2, 1], strides = [1, 1]} : vector<2x128xf32> to vector<2x1xf32>
    %20 = arith.negf %19 : vector<2x1xf32>
    %21 = math.exp %20 : vector<2x1xf32>
    %cst_19 = arith.constant 1.000000e+00 : f32
    %22 = vector.broadcast %cst_19 : f32 to vector<2x1xf32>
    %23 = arith.addf %22, %21 : vector<2x1xf32>
    %24 = arith.divf %22, %23 : vector<2x1xf32>
    %c0_20 = arith.constant 0 : index
    %c0_21 = arith.constant 0 : index
    %25 = vector.load %arg8[%c0_20, %c0_21] : memref<2x1xf32, #tpu.memory_space<vmem>>, vector<2x1xf32>
    tpu.vector_store %arg8[%c0_20, %c0_21], %24 {strides = array<i32>} : memref<2x1xf32, #tpu.memory_space<vmem>>, vector<2x1xf32>,
    %26 = vector.extract_strided_slice %18 {offsets = [0, 1], sizes = [2, 1], strides = [1, 1]} : vector<2x128xf32> to vector<2x1xf32>
    %cst_22 = arith.constant 0.000000e+00 : f32
    %27 = vector.broadcast %cst_22 : f32 to vector<2x1xf32>
    %28 = arith.maximumf %26, %27 : vector<2x1xf32>
    %c0_23 = arith.constant 0 : index
    %c0_24 = arith.constant 0 : index
    %29 = vector.load %arg9[%c0_23, %c0_24] : memref<2x1xf32, #tpu.memory_space<vmem>>, vector<2x1xf32>
    tpu.vector_store %arg9[%c0_23, %c0_24], %28 {strides = array<i32>} : memref<2x1xf32, #tpu.memory_space<vmem>>, vector<2x1xf32>,
    return
  }
}

</mosaic_0001>

<bundles_post_ra>
// kernel: separate_model_snr.1
= control target key start
LH: loop header
LB: loop body
LE: loop exit
PB: predicated region body
PF: predicated region fallthrough
CT: control target
= control target key end

     0   :  { %vm279_vm0 = vcmask 261120   ;;  %v1596_v34 = vmov 1983009808   ;;  %v735_v36 = vlaneseq  ;;  %vm1598_vm1 = vmmov 0   ;;  %s2041_s1 = inlined_call_operand.vmem [shape: bf16[32,128], index: 1, kind: input, shape index: {}]   ;;  %s2042_s0 = inlined_call_operand.vmem [shape: bf16[512,32], index: 0, kind: input, shape index: {}]   ;;  %s2043_s3 = inlined_call_operand.vmem [shape: f32[2,512], index: 3, kind: input, shape index: {}]   ;;  %s2044_s2 = inlined_call_operand.vmem [shape: f32[1,128], index: 2, kind: input, shape index: {}]   ;;  %s2045_s6 = inlined_call_operand.vmem [shape: f32[128,128], index: 6, kind: input, shape index: {}]   ;;  %s2046_s5 = inlined_call_operand.vmem [shape: f32[128,128], index: 5, kind: input, shape index: {}]   ;;  %s2047_s4 = inlined_call_operand.vmem [shape: f32[2,128], index: 4, kind: input, shape index: {}]   ;;  %s2048_s7 = inlined_call_operand.vmem [shape: f32[1,128], index: 7, kind: input, shape index: {}]   ;;  %s2049_s8 = inlined_call_operand.vmem [shape: f32[2,1], index: 8, kind: output, shape index: {0}]   ;;  %s2050_s9 = inlined_call_operand.vmem [shape: f32[2,1], index: 9, kind: output, shape index: {1}]  }
   0x1   :  { %v1557_v0 = vld [vmem:[%s2041_s1] sm:$0xff]   ;;  %v1558_v1 = vld [vmem:[%s2041_s1 + $0x8] sm:$0xff]   ;;  %v1561_v4 = vld [vmem:[%s2042_s0 + $0x10] sm:$0xff]   ;;  %v733_v35 = vunpack.c.l.s4 %v1596_v34  ;;  %vm1079_vm2 = vcmask 1024  }
   0x2   :  { %1302 = vmatprep.subr.bf16.mxu0 %v1557_v0  ;;  %v1559_v2 = vld [vmem:[%s2042_s0] sm:$0xff]   ;;  %v1560_v3 = vld [vmem:[%s2042_s0 + $0x8] sm:$0xff]   ;;  %v1562_v5 = vld [vmem:[%s2042_s0 + $0x18] sm:$0xff]   ;;  %v736_v38 = vshrl.u32 %v735_v36, 7 }
   0x3   :  { %1303 = vmatpush3.bf16.msra.mxu0 %v1557_v0  ;;  %1306 = vmatprep.mubr.msk.bf16.mxu0 %vm279_vm0, %v1559_v2  ;;  %v1563_v6 = vld [vmem:[%s2042_s0 + $0x20] sm:$0xff]   ;;  %v1564_v7 = vld [vmem:[%s2042_s0 + $0x28] sm:$0xff]   ;;  %v1565_v8 = vld [vmem:[%s2042_s0 + $0x30] sm:$0xff]   ;;  %v734_v37 = vunpack.c.0.s8 %v733_v35 }
   0x4   :  { %1304 = vmatprep.subr.bf16.mxu0 %v1558_v1  ;;  %v1566_v9 = vld [vmem:[%s2042_s0 + $0x38] sm:$0xff]   ;;  %v1567_v10 = vld [vmem:[%s2042_s0 + $0x40] sm:$0xff]   ;;  %v1568_v11 = vld [vmem:[%s2042_s0 + $0x48] sm:$0xff]  }
   0x5   :  { %v1569_v12 = vld [vmem:[%s2042_s0 + $0x50] sm:$0xff]   ;;  %v1570_v13 = vld [vmem:[%s2042_s0 + $0x58] sm:$0xff]   ;;  %v1571_v14 = vld [vmem:[%s2042_s0 + $0x60] sm:$0xff]   ;;  %v737_v39 = vsub.s32 %v734_v37, %v736_v38 }
   0x6   :  { %v1572_v15 = vld [vmem:[%s2042_s0 + $0x68] sm:$0xff]   ;;  %v1573_v16 = vld [vmem:[%s2042_s0 + $0x70] sm:$0xff]   ;;  %v1574_v17 = vld [vmem:[%s2042_s0 + $0x78] sm:$0xff]  }
   0x7   :  { %1305 = vmatpush3.bf16.msra.mxu0 %v1558_v1  ;;  %v1575_v18 = vld [vmem:[%s2042_s0 + $0x80] sm:$0xff]   ;;  %v1576_v19 = vld [vmem:[%s2042_s0 + $0x88] sm:$0xff]   ;;  %v1577_v20 = vld [vmem:[%s2042_s0 + $0x90] sm:$0xff]  }
   0x8   :  { %v1578_v21 = vld [vmem:[%s2042_s0 + $0x98] sm:$0xff]   ;;  %v1579_v22 = vld [vmem:[%s2042_s0 + $0xa0] sm:$0xff]   ;;  %v1580_v23 = vld [vmem:[%s2042_s0 + $0xa8] sm:$0xff]  }
   0x9   :  { %v1581_v24 = vld [vmem:[%s2042_s0 + $0xb0] sm:$0xff]   ;;  %v1582_v25 = vld [vmem:[%s2042_s0 + $0xb8] sm:$0xff]   ;;  %v1583_v26 = vld [vmem:[%s2042_s0 + $0xc0] sm:$0xff]  }
   0xa   :  { %1307 = vmatmul.mubr.msk.bf16.vlgmr.msra.gmra.mrb[0].mxu0 %vm279_vm0, %v1560_v3  ;;  %v1584_v27 = vld [vmem:[%s2042_s0 + $0xc8] sm:$0xff]   ;;  %v1585_v28 = vld [vmem:[%s2042_s0 + $0xd0] sm:$0xff]   ;;  %v1586_v29 = vld [vmem:[%s2042_s0 + $0xd8] sm:$0xff]  }
   0xb   :  { %1310 = vmatprep.mubr.msk.bf16.mxu0 %vm279_vm0, %v1561_v4  ;;  %v1587_v30 = vld [vmem:[%s2042_s0 + $0xe0] sm:$0xff]   ;;  %v1588_v31 = vld [vmem:[%s2042_s0 + $0xe8] sm:$0xff]   ;;  %v1589_v32 = vld [vmem:[%s2042_s0 + $0xf0] sm:$0xff]  }
   0xc   :  { %v1590_v33 = vld [vmem:[%s2042_s0 + $0xf8] sm:$0xff]   ;;  %v729_v40 = vld [vmem:[%s2043_s3] sm:$0xff] }
   0xd   :  { %v1788_v41 = vrot.slane %v729_v40, %v737_v39  ;;  %v1795_v43 = vld [vmem:[%s2044_s2] ss:$0 sm:$0xff]  ;;  %v731_v47 = vcombine.high %v729_v40, %v729_v40 }
   0xf   :  { %v746_v42 = vcombine.high %v1788_v41, %v1788_v41  ;;  %v1801_v55 = vrot.slane %v731_v47, %v737_v39 }
  0x11   :  { %816 = vmatprep.mubr.f32.mxu1 %v746_v42 }
  0x12   :  { %1311 = vmatmul.mubr.msk.bf16.gmra.mrb[4].mxu0 %vm279_vm0, %v1562_v5 }
  0x13   :  { %1314 = vmatprep.mubr.msk.bf16.mxu0 %vm279_vm0, %v1563_v6 }
  0x1a   :  { %1315 = vmatmul.mubr.msk.bf16.gmra.mrb[8].mxu0 %vm279_vm0, %v1564_v7 }
  0x1b   :  { %1318 = vmatprep.mubr.msk.bf16.mxu0 %vm279_vm0, %v1565_v8 }
  0x22   :  { %1319 = vmatmul.mubr.msk.bf16.gmra.mrb[12].mxu0 %vm279_vm0, %v1566_v9 }
  0x23   :  { %1322 = vmatprep.mubr.msk.bf16.mxu0 %vm279_vm0, %v1567_v10 }
  0x2a   :  { %1323 = vmatmul.mubr.msk.bf16.gmra.mrb[16].mxu0 %vm279_vm0, %v1568_v11 }
  0x2b   :  { %1326 = vmatprep.mubr.msk.bf16.mxu0 %vm279_vm0, %v1569_v12 }
  0x32   :  { %1327 = vmatmul.mubr.msk.bf16.gmra.mrb[20].mxu0 %vm279_vm0, %v1570_v13 }
  0x33   :  { %1330 = vmatprep.mubr.msk.bf16.mxu0 %vm279_vm0, %v1571_v14 }
  0x3a   :  { %1331 = vmatmul.mubr.msk.bf16.gmra.mrb[24].mxu0 %vm279_vm0, %v1572_v15 }
  0x3b   :  { %1334 = vmatprep.mubr.msk.bf16.mxu0 %vm279_vm0, %v1573_v16 }
  0x42   :  { %1335 = vmatmul.mubr.msk.bf16.gmra.mrb[28].mxu0 %vm279_vm0, %v1574_v17 }
  0x43   :  { %1338 = vmatprep.mubr.msk.bf16.mxu0 %vm279_vm0, %v1575_v18 }
  0x4a   :  { %1339 = vmatmul.mubr.msk.bf16.gmra.mrb[32].mxu0 %vm279_vm0, %v1576_v19 }
  0x4b   :  { %1342 = vmatprep.mubr.msk.bf16.mxu0 %vm279_vm0, %v1577_v20 }
  0x52   :  { %1343 = vmatmul.mubr.msk.bf16.gmra.mrb[36].mxu0 %vm279_vm0, %v1578_v21 }
  0x53   :  { %1346 = vmatprep.mubr.msk.bf16.mxu0 %vm279_vm0, %v1579_v22 }
  0x5a   :  { %1347 = vmatmul.mubr.msk.bf16.gmra.mrb[40].mxu0 %vm279_vm0, %v1580_v23 }
  0x5b   :  { %1350 = vmatprep.mubr.msk.bf16.mxu0 %vm279_vm0, %v1581_v24 }
  0x62   :  { %1351 = vmatmul.mubr.msk.bf16.gmra.mrb[44].mxu0 %vm279_vm0, %v1582_v25 }
  0x63   :  { %1354 = vmatprep.mubr.msk.bf16.mxu0 %vm279_vm0, %v1583_v26 }
  0x6a   :  { %1355 = vmatmul.mubr.msk.bf16.gmra.mrb[48].mxu0 %vm279_vm0, %v1584_v27 }
  0x6b   :  { %1358 = vmatprep.mubr.msk.bf16.mxu0 %vm279_vm0, %v1585_v28 }
  0x72   :  { %1359 = vmatmul.mubr.msk.bf16.gmra.mrb[52].mxu0 %vm279_vm0, %v1586_v29 }
  0x73   :  { %1362 = vmatprep.mubr.msk.bf16.mxu0 %vm279_vm0, %v1587_v30 }
  0x7a   :  { %1363 = vmatmul.mubr.msk.bf16.gmra.mrb[56].mxu0 %vm279_vm0, %v1588_v31 }
  0x7b   :  { %1366 = vmatprep.mubr.msk.bf16.mxu0 %vm279_vm0, %v1589_v32 }
  0x82   :  { %1367 = vmatmul.mubr.msk.bf16.gmra.mrb[60].mxu0 %vm279_vm0, %v1590_v33 }
  0xdd   :  { %v1308_v44 = vpop.f32.mrb[0].mxu0 }
  0xde   :  { %v419_v45 = vadd.f32 %v1308_v44, %v1795_v43  ;;  %v410_v46 = vpop.f32.mrb[1].mxu0 }
  0xdf   :  { %v411_v48 = vadd.f32 %v1795_v43, %v410_v46  ;;  %v1309_v49 = vpop.f32.mrb[2].mxu0 }
  0xe0   :  { %v422_v50 = vadd.f32 %v1309_v49, %v1795_v43  ;;  %v413_v51 = vpop.f32.mrb[3].mxu0  ;;  %v667_v53 = vmax.f32 %v419_v45, 0.0 }
  0xe1   :  { %v414_v52 = vadd.f32 %v1795_v43, %v413_v51  ;;  %v665_v56 = vmax.f32 %v411_v48, 0.0 }
  0xe2   :  { %v668_v54 = vmax.f32 %v422_v50, 0.0 }
  0xe3   :  { %v666_v57 = vmax.f32 %v414_v52, 0.0 }
  0xe4   :  { %v1803_v58 = vpack.c.bf16 %v668_v54, %v667_v53 }
  0xe5   :  { %v1312_v59 = vpop.f32.mrb[4].mxu0  ;;  %v1805_v60 = vpack.c.bf16 %v666_v57, %v665_v56 }
  0xe6   :  { %v435_v61 = vadd.f32 %v1312_v59, %v1795_v43  ;;  %v426_v62 = vpop.f32.mrb[5].mxu0 }
  0xe7   :  { %v427_v63 = vadd.f32 %v1795_v43, %v426_v62  ;;  %v1313_v0 = vpop.f32.mrb[6].mxu0 }
  0xe8   :  { %v438_v1 = vadd.f32 %v1313_v0, %v1795_v43  ;;  %v429_v2 = vpop.f32.mrb[7].mxu0  ;;  %v671_v4 = vmax.f32 %v435_v61, 0.0 }
  0xe9   :  { %v430_v3 = vadd.f32 %v1795_v43, %v429_v2  ;;  %v669_v6 = vmax.f32 %v427_v63, 0.0 }
  0xea   :  { %v672_v5 = vmax.f32 %v438_v1, 0.0 }
  0xeb   :  { %v670_v7 = vmax.f32 %v430_v3, 0.0 }
  0xec   :  { %v1811_v8 = vpack.c.bf16 %v672_v5, %v671_v4 }
  0xed   :  { %v1813_v9 = vpack.c.bf16 %v670_v7, %v669_v6  ;;  %v1316_v10 = vpop.f32.mrb[8].mxu0 }
  0xee   :  { %v451_v11 = vadd.f32 %v1316_v10, %v1795_v43  ;;  %v442_v12 = vpop.f32.mrb[9].mxu0 }
  0xef   :  { %v443_v13 = vadd.f32 %v1795_v43, %v442_v12  ;;  %v1317_v14 = vpop.f32.mrb[10].mxu0 }
  0xf0   :  { %v454_v15 = vadd.f32 %v1317_v14, %v1795_v43  ;;  %v445_v16 = vpop.f32.mrb[11].mxu0  ;;  %v675_v18 = vmax.f32 %v451_v11, 0.0 }
  0xf1   :  { %v446_v17 = vadd.f32 %v1795_v43, %v445_v16  ;;  %v673_v20 = vmax.f32 %v443_v13, 0.0 }
  0xf2   :  { %v676_v19 = vmax.f32 %v454_v15, 0.0 }
  0xf3   :  { %v674_v21 = vmax.f32 %v446_v17, 0.0 }
  0xf4   :  { %v1819_v22 = vpack.c.bf16 %v676_v19, %v675_v18 }
  0xf5   :  { %v1821_v23 = vpack.c.bf16 %v674_v21, %v673_v20  ;;  %v1320_v24 = vpop.f32.mrb[12].mxu0 }
  0xf6   :  { %v467_v25 = vadd.f32 %v1320_v24, %v1795_v43  ;;  %v458_v26 = vpop.f32.mrb[13].mxu0 }
  0xf7   :  { %v459_v27 = vadd.f32 %v1795_v43, %v458_v26  ;;  %v1321_v28 = vpop.f32.mrb[14].mxu0 }
  0xf8   :  { %v470_v29 = vadd.f32 %v1321_v28, %v1795_v43  ;;  %v461_v30 = vpop.f32.mrb[15].mxu0  ;;  %v679_v32 = vmax.f32 %v467_v25, 0.0 }
  0xf9   :  { %v462_v31 = vadd.f32 %v1795_v43, %v461_v30  ;;  %v677_v34 = vmax.f32 %v459_v27, 0.0 }
  0xfa   :  { %v680_v33 = vmax.f32 %v470_v29, 0.0 }
  0xfb   :  { %v678_v35 = vmax.f32 %v462_v31, 0.0 }
  0xfc   :  { %v1827_v36 = vpack.c.bf16 %v680_v33, %v679_v32 }
  0xfd   :  { %v1829_v37 = vpack.c.bf16 %v678_v35, %v677_v34  ;;  %v1324_v38 = vpop.f32.mrb[16].mxu0 }
  0xfe   :  { %v483_v39 = vadd.f32 %v1324_v38, %v1795_v43  ;;  %v474_v40 = vpop.f32.mrb[17].mxu0 }
  0xff   :  { %v475_v42 = vadd.f32 %v1795_v43, %v474_v40  ;;  %v1325_v44 = vpop.f32.mrb[18].mxu0 }
 0x100   :  { %v486_v45 = vadd.f32 %v1325_v44, %v1795_v43  ;;  %v477_v46 = vpop.f32.mrb[19].mxu0  ;;  %v683_v48 = vmax.f32 %v483_v39, 0.0 }
 0x101   :  { %v478_v47 = vadd.f32 %v1795_v43, %v477_v46  ;;  %v681_v50 = vmax.f32 %v475_v42, 0.0 }
 0x102   :  { %v684_v49 = vmax.f32 %v486_v45, 0.0 }
 0x103   :  { %v682_v51 = vmax.f32 %v478_v47, 0.0 }
 0x104   :  { %v1444_v52 = vpack.c.bf16 %v684_v49, %v683_v48 }
 0x105   :  { %v1328_v53 = vpop.f32.mrb[20].mxu0  ;;  %v1440_v54 = vpack.c.bf16 %v682_v51, %v681_v50  ;;  %v747_v50 = vcombine.high %v1801_v55, %v1801_v55 }
 0x106   :  { %v499_v56 = vadd.f32 %v1328_v53, %v1795_v43  ;;  %v490_v57 = vpop.f32.mrb[21].mxu0 }
 0x107   :  { %v491_v59 = vadd.f32 %v1795_v43, %v490_v57  ;;  %v1329_v61 = vpop.f32.mrb[22].mxu0  ;;  %1441 = vmatprep.subr.bf16.mxu1 %v1440_v54 }
 0x108   :  { %v502_v62 = vadd.f32 %v1329_v61, %v1795_v43  ;;  %v493_v63 = vpop.f32.mrb[23].mxu0  ;;  %1443 = vmatpush3.bf16.msra.mxu1 %v1805_v60  ;;  %v687_v1 = vmax.f32 %v499_v56, 0.0 }
 0x109   :  { %v494_v0 = vadd.f32 %v1795_v43, %v493_v63  ;;  %1445 = vmatprep.subr.bf16.mxu1 %v1444_v52  ;;  %v685_v3 = vmax.f32 %v491_v59, 0.0 }
 0x10a   :  { %v688_v2 = vmax.f32 %v502_v62, 0.0 }
 0x10b   :  { %v686_v4 = vmax.f32 %v494_v0, 0.0 }
 0x10c   :  { %v1452_v5 = vpack.c.bf16 %v688_v2, %v687_v1  ;;  %1447 = vmatpush3.bf16.msra.mxu1 %v1803_v58 }
 0x10d   :  { %v1448_v6 = vpack.c.bf16 %v686_v4, %v685_v3  ;;  %v1332_v7 = vpop.f32.mrb[24].mxu0 }
 0x10e   :  { %v515_v10 = vadd.f32 %v1332_v7, %v1795_v43  ;;  %v506_v11 = vpop.f32.mrb[25].mxu0 }
 0x10f   :  { %v507_v12 = vadd.f32 %v1795_v43, %v506_v11  ;;  %v1333_v13 = vpop.f32.mrb[26].mxu0  ;;  %1449 = vmatprep.subr.bf16.mxu1 %v1448_v6 }
 0x110   :  { %v518_v60 = vadd.f32 %v1333_v13, %v1795_v43  ;;  %v509_v14 = vpop.f32.mrb[27].mxu0  ;;  %1451 = vmatpush3.bf16.msra.mxu1 %v1813_v9  ;;  %v691_v16 = vmax.f32 %v515_v10, 0.0 }
 0x111   :  { %v510_v15 = vadd.f32 %v1795_v43, %v509_v14  ;;  %1453 = vmatprep.subr.bf16.mxu1 %v1452_v5  ;;  %v689_v58 = vmax.f32 %v507_v12, 0.0 }
 0x112   :  { %v692_v17 = vmax.f32 %v518_v60, 0.0 }
 0x113   :  { %v690_v18 = vmax.f32 %v510_v15, 0.0 }
 0x114   :  { %v1460_v19 = vpack.c.bf16 %v692_v17, %v691_v16  ;;  %1455 = vmatpush3.bf16.msra.mxu1 %v1811_v8 }
 0x115   :  { %v1456_v20 = vpack.c.bf16 %v690_v18, %v689_v58  ;;  %v1336_v21 = vpop.f32.mrb[28].mxu0 }
 0x116   :  { %v531_v24 = vadd.f32 %v1336_v21, %v1795_v43  ;;  %v522_v25 = vpop.f32.mrb[29].mxu0 }
 0x117   :  { %v523_v26 = vadd.f32 %v1795_v43, %v522_v25  ;;  %v1337_v27 = vpop.f32.mrb[30].mxu0  ;;  %1457 = vmatprep.subr.bf16.mxu1 %v1456_v20 }
 0x118   :  { %v534_v9 = vadd.f32 %v1337_v27, %v1795_v43  ;;  %v525_v28 = vpop.f32.mrb[31].mxu0  ;;  %1459 = vmatpush3.bf16.msra.mxu1 %v1821_v23  ;;  %v695_v30 = vmax.f32 %v531_v24, 0.0 }
 0x119   :  { %v526_v29 = vadd.f32 %v1795_v43, %v525_v28  ;;  %1461 = vmatprep.subr.bf16.mxu1 %v1460_v19  ;;  %v693_v8 = vmax.f32 %v523_v26, 0.0 }
 0x11a   :  { %v696_v31 = vmax.f32 %v534_v9, 0.0 }
 0x11b   :  { %v694_v32 = vmax.f32 %v526_v29, 0.0 }
 0x11c   :  { %v1468_v33 = vpack.c.bf16 %v696_v31, %v695_v30  ;;  %1463 = vmatpush3.bf16.msra.mxu1 %v1819_v22 }
 0x11d   :  { %v1464_v34 = vpack.c.bf16 %v694_v32, %v693_v8  ;;  %v1340_v35 = vpop.f32.mrb[32].mxu0 }
 0x11e   :  { %v547_v38 = vadd.f32 %v1340_v35, %v1795_v43  ;;  %v538_v39 = vpop.f32.mrb[33].mxu0 }
 0x11f   :  { %v539_v40 = vadd.f32 %v1795_v43, %v538_v39  ;;  %v1341_v42 = vpop.f32.mrb[34].mxu0  ;;  %1465 = vmatprep.subr.bf16.mxu1 %v1464_v34 }
 0x120   :  { %v550_v23 = vadd.f32 %v1341_v42, %v1795_v43  ;;  %v541_v44 = vpop.f32.mrb[35].mxu0  ;;  %1467 = vmatpush3.bf16.msra.mxu1 %v1829_v37  ;;  %v699_v46 = vmax.f32 %v547_v38, 0.0 }
 0x121   :  { %v542_v45 = vadd.f32 %v1795_v43, %v541_v44  ;;  %1469 = vmatprep.subr.bf16.mxu1 %v1468_v33  ;;  %v697_v22 = vmax.f32 %v539_v40, 0.0 }
 0x122   :  { %v700_v47 = vmax.f32 %v550_v23, 0.0 }
 0x123   :  { %v698_v48 = vmax.f32 %v542_v45, 0.0 }
 0x124   :  { %v1858_v49 = vpack.c.bf16 %v700_v47, %v699_v46  ;;  %1471 = vmatpush3.bf16.msra.mxu1 %v1827_v36 }
 0x125   :  { %v1863_v51 = vpack.c.bf16 %v698_v48, %v697_v22  ;;  %v1344_v52 = vpop.f32.mrb[36].mxu0 }
 0x126   :  { %v563_v53 = vadd.f32 %v1344_v52, %v1795_v43  ;;  %v554_v37 = vpop.f32.mrb[37].mxu0 }
 0x127   :  { %v555_v54 = vadd.f32 %v1795_v43, %v554_v37  ;;  %v1345_v56 = vpop.f32.mrb[38].mxu0  ;;  %817 = vmatmul.mubr.f32.vlgmr.msra.gmra.mrb[0].mxu1 %v1788_v41 }
 0x128   :  { %v566_v57 = vadd.f32 %v1345_v56, %v1795_v43  ;;  %v557_v59 = vpop.f32.mrb[39].mxu0  ;;  %886 = vmatprep.mubr.f32.mxu1 %v747_v50  ;;  %v703_v61 = vmax.f32 %v563_v53, 0.0 }
 0x129   :  { %v558_v36 = vadd.f32 %v1795_v43, %v557_v59  ;;  %v701_v63 = vmax.f32 %v555_v54, 0.0 }
 0x12a   :  { %v704_v62 = vmax.f32 %v566_v57, 0.0 }
 0x12b   :  { %v702_v0 = vmax.f32 %v558_v36, 0.0 }
 0x12c   :  { %v1870_v1 = vpack.c.bf16 %v704_v62, %v703_v61 }
 0x12d   :  { %v1872_v2 = vpack.c.bf16 %v702_v0, %v701_v63  ;;  %v1348_v3 = vpop.f32.mrb[40].mxu0 }
 0x12e   :  { %v579_v4 = vadd.f32 %v1348_v3, %v1795_v43  ;;  %v570_v5 = vpop.f32.mrb[41].mxu0 }
 0x12f   :  { %v571_v41 = vadd.f32 %v1795_v43, %v570_v5  ;;  %v1349_v6 = vpop.f32.mrb[42].mxu0 }
 0x130   :  { %v582_v7 = vadd.f32 %v1349_v6, %v1795_v43  ;;  %v573_v10 = vpop.f32.mrb[43].mxu0  ;;  %v707_v12 = vmax.f32 %v579_v4, 0.0 }
 0x131   :  { %v574_v11 = vadd.f32 %v1795_v43, %v573_v10  ;;  %v705_v60 = vmax.f32 %v571_v41, 0.0 }
 0x132   :  { %v708_v13 = vmax.f32 %v582_v7, 0.0 }
 0x133   :  { %v706_v14 = vmax.f32 %v574_v11, 0.0 }
 0x134   :  { %v1878_v15 = vpack.c.bf16 %v708_v13, %v707_v12 }
 0x135   :  { %v1880_v16 = vpack.c.bf16 %v706_v14, %v705_v60  ;;  %v1352_v17 = vpop.f32.mrb[44].mxu0 }
 0x136   :  { %v595_v58 = vadd.f32 %v1352_v17, %v1795_v43  ;;  %v586_v18 = vpop.f32.mrb[45].mxu0 }
 0x137   :  { %v587_v19 = vadd.f32 %v1795_v43, %v586_v18  ;;  %v1353_v20 = vpop.f32.mrb[46].mxu0 }
 0x138   :  { %v598_v21 = vadd.f32 %v1353_v20, %v1795_v43  ;;  %v589_v24 = vpop.f32.mrb[47].mxu0  ;;  %v711_v26 = vmax.f32 %v595_v58, 0.0 }
 0x139   :  { %v590_v25 = vadd.f32 %v1795_v43, %v589_v24  ;;  %v709_v9 = vmax.f32 %v587_v19, 0.0 }
 0x13a   :  { %v712_v27 = vmax.f32 %v598_v21, 0.0 }
 0x13b   :  { %v710_v28 = vmax.f32 %v590_v25, 0.0 }
 0x13c   :  { %v1886_v29 = vpack.c.bf16 %v712_v27, %v711_v26 }
 0x13d   :  { %v1888_v30 = vpack.c.bf16 %v710_v28, %v709_v9  ;;  %v1356_v31 = vpop.f32.mrb[48].mxu0  ;;  %v909_v9 = vld [vmem:[%s2045_s6] sm:$0xff]  ;;  %v1597_v28 = vmov 0.0|0.0  }
 0x13e   :  { %v611_v8 = vadd.f32 %v1356_v31, %v1795_v43  ;;  %v602_v32 = vpop.f32.mrb[49].mxu0 }
 0x13f   :  { %v603_v33 = vadd.f32 %v1795_v43, %v602_v32  ;;  %v1357_v34 = vpop.f32.mrb[50].mxu0 }
 0x140   :  { %v614_v35 = vadd.f32 %v1357_v34, %v1795_v43  ;;  %v605_v38 = vpop.f32.mrb[51].mxu0  ;;  %v715_v40 = vmax.f32 %v611_v8, 0.0  ;;  %v914_v8 = vld [vmem:[%s2045_s6 + $0x28] sm:$0xff] }
 0x141   :  { %v606_v39 = vadd.f32 %v1795_v43, %v605_v38  ;;  %v713_v23 = vmax.f32 %v603_v33, 0.0  ;;  %v916_v33 = vld [vmem:[%s2045_s6 + $0x38] sm:$0xff]  ;;  %v918_v38 = vld [vmem:[%s2045_s6 + $0x48] sm:$0xff] }
 0x142   :  { %v716_v42 = vmax.f32 %v614_v35, 0.0  ;;  %v917_v35 = vld [vmem:[%s2045_s6 + $0x40] sm:$0xff] }
 0x143   :  { %v714_v44 = vmax.f32 %v606_v39, 0.0  ;;  %v1517_v39 = vpack.c.bf16 %v918_v38, %v917_v35 }
 0x144   :  { %v1476_v45 = vpack.c.bf16 %v716_v42, %v715_v40  ;;  %v919_v40 = vld [vmem:[%s2045_s6 + $0x50] sm:$0xff]  ;;  %v920_v42 = vld [vmem:[%s2045_s6 + $0x58] sm:$0xff] }
 0x145   :  { %v1472_v46 = vpack.c.bf16 %v714_v44, %v713_v23  ;;  %v1360_v47 = vpop.f32.mrb[52].mxu0  ;;  %v1520_v23 = vpack.c.bf16 %v920_v42, %v919_v40  ;;  %v921_v44 = vld [vmem:[%s2045_s6 + $0x60] sm:$0xff] }
 0x146   :  { %v627_v22 = vadd.f32 %v1360_v47, %v1795_v43  ;;  %v618_v48 = vpop.f32.mrb[53].mxu0  ;;  %v923_v47 = vld [vmem:[%s2045_s6 + $0x70] sm:$0xff] }
 0x147   :  { %v619_v50 = vadd.f32 %v1795_v43, %v618_v48  ;;  %v1361_v52 = vpop.f32.mrb[54].mxu0  ;;  %1473 = vmatprep.subr.bf16.mxu1 %v1472_v46  ;;  %v1599_v48 = vmov 0.0  }
 0x148   :  { %v630_v53 = vadd.f32 %v1361_v52, %v1795_v43  ;;  %v621_v37 = vpop.f32.mrb[55].mxu0  ;;  %1475 = vmatpush3.bf16.msra.mxu1 %v1863_v51  ;;  %v719_v56 = vmax.f32 %v627_v22, 0.0  ;;  %v924_v22 = vld [vmem:[%s2045_s6 + $0x78] sm:$0xff]  ;;  %v893_v52 = vld [vmem:[%s2046_s5] sm:$0xff] }
 0x149   :  { %v622_v54 = vadd.f32 %v1795_v43, %v621_v37  ;;  %1477 = vmatprep.subr.bf16.mxu1 %v1476_v45  ;;  %v717_v59 = vmax.f32 %v619_v50, 0.0  ;;  %v922_v45 = vld [vmem:[%s2045_s6 + $0x68] sm:$0xff]  ;;  %v1526_v50 = vpack.c.bf16 %v924_v22, %v923_v47  ;;  %v892_v37 = vld [vmem:[%s2047_s4] sm:$0x3] }
 0x14a   :  { %v720_v57 = vmax.f32 %v630_v53, 0.0  ;;  %v1523_v46 = vpack.c.bf16 %v922_v45, %v921_v44  ;;  %v894_v53 = vld [vmem:[%s2046_s5 + $0x8] sm:$0xff] }
 0x14b   :  { %v718_v36 = vmax.f32 %v622_v54, 0.0  ;;  %v1529_v54 = vpack.c.bf16 %v894_v53, %v893_v52 }
 0x14c   :  { %v1484_v61 = vpack.c.bf16 %v720_v57, %v719_v56  ;;  %1479 = vmatpush3.bf16.msra.mxu1 %v1858_v49  ;;  %v895_v56 = vld [vmem:[%s2046_s5 + $0x10] sm:$0xff]  ;;  %v896_v57 = vld [vmem:[%s2046_s5 + $0x18] sm:$0xff] }
 0x14d   :  { %v1480_v62 = vpack.c.bf16 %v718_v36, %v717_v59  ;;  %v1364_v63 = vpop.f32.mrb[56].mxu0  ;;  %v1532_v59 = vpack.c.bf16 %v896_v57, %v895_v56  ;;  %v897_v36 = vld [vmem:[%s2046_s5 + $0x20] sm:$0xff] }
 0x14e   :  { %v643_v0 = vadd.f32 %v1364_v63, %v1795_v43  ;;  %v634_v3 = vpop.f32.mrb[57].mxu0  ;;  %v899_v63 = vld [vmem:[%s2046_s5 + $0x30] sm:$0xff] }
 0x14f   :  { %v635_v4 = vadd.f32 %v1795_v43, %v634_v3  ;;  %v1365_v5 = vpop.f32.mrb[58].mxu0  ;;  %1481 = vmatprep.subr.bf16.mxu1 %v1480_v62 }
 0x150   :  { %v646_v51 = vadd.f32 %v1365_v5, %v1795_v43  ;;  %v637_v41 = vpop.f32.mrb[59].mxu0  ;;  %1483 = vmatpush3.bf16.msra.mxu1 %v1872_v2  ;;  %v723_v7 = vmax.f32 %v643_v0, 0.0  ;;  %v900_v0 = vld [vmem:[%s2046_s5 + $0x38] sm:$0xff]  ;;  %v902_v5 = vld [vmem:[%s2046_s5 + $0x48] sm:$0xff] }
 0x151   :  { %v638_v6 = vadd.f32 %v1795_v43, %v637_v41  ;;  %1485 = vmatprep.subr.bf16.mxu1 %v1484_v61  ;;  %v721_v49 = vmax.f32 %v635_v4, 0.0  ;;  %v898_v61 = vld [vmem:[%s2046_s5 + $0x28] sm:$0xff]  ;;  %v1538_v3 = vpack.c.bf16 %v900_v0, %v899_v63  ;;  %v901_v4 = vld [vmem:[%s2046_s5 + $0x40] sm:$0xff]  ;;  %v903_v41 = vld [vmem:[%s2046_s5 + $0x50] sm:$0xff] }
 0x152   :  { %v724_v10 = vmax.f32 %v646_v51, 0.0  ;;  %v1535_v62 = vpack.c.bf16 %v898_v61, %v897_v36  ;;  %v1541_v51 = vpack.c.bf16 %v902_v5, %v901_v4 }
 0x153   :  { %v722_v11 = vmax.f32 %v638_v6, 0.0  ;;  %v904_v6 = vld [vmem:[%s2046_s5 + $0x58] sm:$0xff] }
 0x154   :  { %v1492_v12 = vpack.c.bf16 %v724_v10, %v723_v7  ;;  %1487 = vmatpush3.bf16.msra.mxu1 %v1870_v1  ;;  %v1544_v7 = vpack.c.bf16 %v904_v6, %v903_v41  ;;  %v905_v10 = vld [vmem:[%s2046_s5 + $0x60] sm:$0xff] }
 0x155   :  { %v1488_v13 = vpack.c.bf16 %v722_v11, %v721_v49  ;;  %v1368_v60 = vpop.f32.mrb[60].mxu0  ;;  %v906_v49 = vld [vmem:[%s2046_s5 + $0x68] sm:$0xff] }
 0x156   :  { %v659_v14 = vadd.f32 %v1368_v60, %v1795_v43  ;;  %v650_v17 = vpop.f32.mrb[61].mxu0  ;;  %v1547_v11 = vpack.c.bf16 %v906_v49, %v905_v10 }
 0x157   :  { %v651_v58 = vadd.f32 %v1795_v43, %v650_v17  ;;  %v1369_v18 = vpop.f32.mrb[62].mxu0  ;;  %1489 = vmatprep.subr.bf16.mxu1 %v1488_v13  ;;  %v908_v13 = vld [vmem:[%s2046_s5 + $0x78] sm:$0xff] }
 0x158   :  { %v662_v2 = vadd.f32 %v1369_v18, %v1795_v43  ;;  %v653_v19 = vpop.f32.mrb[63].mxu0  ;;  %1491 = vmatpush3.bf16.msra.mxu1 %v1880_v16  ;;  %v727_v21 = vmax.f32 %v659_v14, 0.0 }
 0x159   :  { %v654_v20 = vadd.f32 %v1795_v43, %v653_v19  ;;  %1493 = vmatprep.subr.bf16.mxu1 %v1492_v12  ;;  %v725_v1 = vmax.f32 %v651_v58, 0.0  ;;  %v910_v43 = vld [vmem:[%s2045_s6 + $0x8] sm:$0xff]  ;;  %v907_v12 = vld [vmem:[%s2046_s5 + $0x70] sm:$0xff]  ;;  %s1600_s5 = smov 127  }
 0x15a   :  { %v728_v24 = vmax.f32 %v662_v2, 0.0  ;;  %v1505_v16 = vpack.c.bf16 %v910_v43, %v909_v9  ;;  %v1550_v60 = vpack.c.bf16 %v908_v13, %v907_v12 }
 0x15b   :  { %v726_v25 = vmax.f32 %v654_v20, 0.0 }
 0x15c   :  { %v1500_v26 = vpack.c.bf16 %v728_v24, %v727_v21  ;;  %1495 = vmatpush3.bf16.msra.mxu1 %v1878_v15  ;;  %v911_v15 = vld [vmem:[%s2045_s6 + $0x10] sm:$0xff] }
 0x15d   :  { %v1496_v27 = vpack.c.bf16 %v726_v25, %v725_v1  ;;  %v1162_v25 = vld [vmem:[%s2048_s7] ss:$0 sm:$0xff] }
 0x15f   :  { %1497 = vmatprep.subr.bf16.mxu1 %v1496_v27 }
 0x160   :  { %1499 = vmatpush3.bf16.msra.mxu1 %v1888_v30  ;;  %v912_v30 = vld [vmem:[%s2045_s6 + $0x18] sm:$0xff] }
 0x161   :  { %1501 = vmatprep.subr.bf16.mxu1 %v1500_v26  ;;  %v1508_v31 = vpack.c.bf16 %v912_v30, %v911_v15 }
 0x164   :  { %1503 = vmatpush3.bf16.msra.mxu1 %v1886_v29  ;;  %v913_v29 = vld [vmem:[%s2045_s6 + $0x20] sm:$0xff] }
 0x165   :  { %1504 = vmatprep.subr.bf16.mxu1 %v1597_v28  ;;  %v1511_v32 = vpack.c.bf16 %v914_v8, %v913_v29 }
 0x167   :  { %887 = vmatmul.mubr.f32.vlgmr.msra.gmra.mrb[2].mxu1 %v1801_v55  ;;  %v915_v55 = vld [vmem:[%s2045_s6 + $0x30] sm:$0xff] }
 0x168   :  { %1506 = vmatpush3.bf16.msra.mxu1 %v1505_v16  ;;  %v1514_v34 = vpack.c.bf16 %v916_v33, %v915_v55  ;;  %1402 = vmatprep.mubr.msk.f32.mxu1 %vm1598_vm1, %v1599_v48 }
 0x169   :  { %1507 = vmatprep.subr.bf16.mxu1 %v1597_v28 }
 0x16c   :  { %1509 = vmatpush3.bf16.msra.mxu1 %v1508_v31 }
 0x16d   :  { %1510 = vmatprep.subr.bf16.mxu1 %v1597_v28 }
 0x170   :  { %1512 = vmatpush3.bf16.msra.mxu1 %v1511_v32 }
 0x171   :  { %1513 = vmatprep.subr.bf16.mxu1 %v1597_v28 }
 0x174   :  { %1515 = vmatpush3.bf16.msra.mxu1 %v1514_v34 }
 0x175   :  { %1516 = vmatprep.subr.bf16.mxu1 %v1597_v28 }
 0x178   :  { %1518 = vmatpush3.bf16.msra.mxu1 %v1517_v39 }
 0x179   :  { %1519 = vmatprep.subr.bf16.mxu1 %v1597_v28 }
 0x17c   :  { %1521 = vmatpush3.bf16.msra.mxu1 %v1520_v23 }
 0x17d   :  { %1522 = vmatprep.subr.bf16.mxu1 %v1597_v28 }
 0x180   :  { %1524 = vmatpush3.bf16.msra.mxu1 %v1523_v46 }
 0x181   :  { %1525 = vmatprep.subr.bf16.mxu1 %v1597_v28 }
 0x184   :  { %1527 = vmatpush3.bf16.msra.mxu1 %v1526_v50 }
 0x185   :  { %1528 = vmatprep.subr.bf16.mxu1 %v1597_v28 }
 0x187   :  { %1403 = vmatmul.mubr.f32.vlgmr.msra.gmra.mrb[4].mxu1 %v892_v37 }
 0x188   :  { %1530 = vmatpush3.bf16.msra.mxu1 %v1529_v54  ;;  %1437 = vmatprep.mubr.msk.f32.mxu1 %vm1598_vm1, %v1599_v48 }
 0x189   :  { %1531 = vmatprep.subr.bf16.mxu1 %v1597_v28 }
 0x18c   :  { %1533 = vmatpush3.bf16.msra.mxu1 %v1532_v59 }
 0x18d   :  { %1534 = vmatprep.subr.bf16.mxu1 %v1597_v28 }
 0x190   :  { %1536 = vmatpush3.bf16.msra.mxu1 %v1535_v62 }
 0x191   :  { %1537 = vmatprep.subr.bf16.mxu1 %v1597_v28 }
 0x194   :  { %1539 = vmatpush3.bf16.msra.mxu1 %v1538_v3 }
 0x195   :  { %1540 = vmatprep.subr.bf16.mxu1 %v1597_v28 }
 0x198   :  { %1542 = vmatpush3.bf16.msra.mxu1 %v1541_v51 }
 0x199   :  { %1543 = vmatprep.subr.bf16.mxu1 %v1597_v28 }
 0x19c   :  { %1545 = vmatpush3.bf16.msra.mxu1 %v1544_v7 }
 0x19d   :  { %1546 = vmatprep.subr.bf16.mxu1 %v1597_v28 }
 0x1a0   :  { %1548 = vmatpush3.bf16.msra.mxu1 %v1547_v11 }
 0x1a1   :  { %1549 = vmatprep.subr.bf16.mxu1 %v1597_v28 }
 0x1a4   :  { %1551 = vmatpush3.bf16.msra.mxu1 %v1550_v60 }
 0x1fa   :  { %v1230_v14 = vpop.f32.mrb[0].mxu1 }
 0x1fb   :  { %v1231_v17 = vpop.f32.mrb[1].mxu1 }
 0x1fc   :  { %v1232_v58 = vadd.f32 %v1231_v17, %v1230_v14 }
 0x23a   :  { %v1265_v18 = vpop.f32.mrb[2].mxu1 }
 0x23b   :  { %v1266_v2 = vpop.f32.mrb[3].mxu1 }
 0x23c   :  { %v1267_v19 = vadd.f32 %v1266_v2, %v1265_v18 }
 0x23e   :  { %v889_v20 = vadd.f32 %v1267_v19, %v1232_v58 }
 0x240   :  { %1438 = vmatmul.mubr.f32.vlgmr.msra.gmra.mrb[6].mxu1 %v889_v20 }
 0x25a   :  { %v991_v21 = vpop.f32.mrb[4].mxu1 }
 0x25b   :  { %v1404_v24 = vpop.f32.mrb[5].mxu1 }
 0x313   :  { %v1061_v1 = vpop.f32.mrb[6].mxu1 }
 0x314   :  { %v1062_v26 = vadd.f32 %v1061_v1, %v991_v21  ;;  %v1439_v27 = vpop.f32.mrb[7].mxu1 }
 0x316   :  { %v1072_v9 = vadd.f32 %v1162_v25, %v1062_v26 }
 0x318   :  { %v1163_v43 = vmul.f32 -1.442695, %v1072_v9  ;;  %v1081_v16 = vmax.f32 %v1072_v9, 0.0 }
 0x31a   :  { %1592 = vpow2.f32 %v1163_v43  ;;  %1083 = vrot.lane.b32.xlu0 %v1081_v16, %s1600_s5 }
 0x324   :  { %v1593_v28 = vpop.eup %1592 }
 0x325   :  { %v1076_v15 = vadd.f32 1.0, %v1593_v28 }
 0x327   :  { %1594 = vrcp.f32 %v1076_v15 }
 0x331   :  { %v1595_v30 = vpop.eup %1594 }
 0x332   :  { %1080 = vst.msk [vmem:[%s2049_s8] sm:$0x3] %vm1079_vm2, %v1595_v30 }
 0x38c   :  { %v1084_v31 = vpop.permute.xlu0 %1083 }
 0x38d   :  { %1086 = vst.msk [vmem:[%s2050_s9] sm:$0x3] %vm1079_vm2, %v1084_v31 }

</bundles_post_ra>
